<compile_context>
chip_gen: v7x
topology: tpu7x:2x2x1
jax: 0.10.0
libtpu: 0.0.40
codegen_flags: <defaults>
</compile_context>

<pallas_src>
import functools

import jax
import jax.numpy as jnp
from jax.experimental import pallas as pl
from jax.experimental.pallas import tpu as pltpu

EPSILON = 1e-5
_LANES = 128
_SUBLANES = 8


def _make_l1_kernel(n_true: int, epsilon: float):
    """Kernel closure over the true (unpadded) element count and epsilon."""
    inv_n = 1.0 / float(n_true)

    def kernel(pred_ref, target_ref, out_ref):
        # Full lane-dense tiles are resident in VMEM; pure elementwise + reduce.
        diff = jnp.abs(
            target_ref[...].astype(jnp.float32) - pred_ref[...].astype(jnp.float32)
        )
        # Padded elements are exactly zero in both inputs -> contribute 0.
        out_ref[0, 0] = jnp.sum(diff) * jnp.float32(inv_n) + jnp.float32(epsilon)

    return kernel


def _to_lane_dense(x: jax.Array, rows: int) -> jax.Array:
    """Flatten and zero-pad to a (rows, 128) float32 slab."""
    flat = x.reshape(-1).astype(jnp.float32)
    pad = rows * _LANES - flat.shape[0]
    flat = jnp.pad(flat, (0, pad))
    return flat.reshape(rows, _LANES)


@functools.partial(jax.jit, static_argnames=("epsilon",))
def l1_loss(pred: jax.Array, target: jax.Array, epsilon: float = EPSILON) -> jax.Array:
    """Pallas TPU implementation of the PyTorch L1Loss module's forward."""
    assert pred.shape == target.shape
    n_true = pred.size

    # Lane-dense layout: ceil(N/128) rows, rounded up to a multiple of 8 sublanes.
    rows = pl.cdiv(n_true, _LANES)
    rows = ((rows + _SUBLANES - 1) // _SUBLANES) * _SUBLANES

    pred_ld = _to_lane_dense(pred, rows)
    target_ld = _to_lane_dense(target, rows)

    out = pl.pallas_call(
        _make_l1_kernel(n_true, epsilon),
        out_shape=jax.ShapeDtypeStruct((1, 1), jnp.float32),
        in_specs=[
            pl.BlockSpec(memory_space=pltpu.MemorySpace.VMEM),
            pl.BlockSpec(memory_space=pltpu.MemorySpace.VMEM),
        ],
        out_specs=pl.BlockSpec(memory_space=pltpu.MemorySpace.SMEM),
    )(pred_ld, target_ld)
    return out[0, 0]


def _reference(pred, target, epsilon=EPSILON):
    # Mirrors torch.mean(torch.abs_(target - pred) + eps, dim=1).mean()
    return jnp.mean(jnp.mean(jnp.abs(target - pred) + epsilon, axis=1))


if __name__ == "__main__":
    key = jax.random.PRNGKey(0)
    k1, k2 = jax.random.split(key)
    B, L = 8, 30  # Bx30 landmarks, as in the module docstring
    target = jax.random.uniform(k1, (B, L), dtype=jnp.float32)
    pred = target + 0.3 * jax.random.normal(k2, (B, L), dtype=jnp.float32)

    out = l1_loss(pred, target)
    out = jax.block_until_ready(out)

    ref = _reference(pred, target)
    assert jnp.allclose(out, ref, atol=1e-6, rtol=1e-6), (out, ref)
    print("KERNEL_OK")
</pallas_src>

<mosaic_0001>
module attributes {stable_mosaic.version = 11 : i64} {
  func.func @kernel(%arg0: memref<8x128xf32, #tpu.memory_space<vmem>>, %arg1: memref<8x128xf32, #tpu.memory_space<vmem>>, %arg2: memref<1x1xf32, #tpu.memory_space<smem>>) attributes {dimension_semantics = [], scalar_prefetch = 0 : i64, scratch_operands = 0 : i64, tpu.core_type = #tpu.core_type<tc>} {
    %c0 = arith.constant 0 : index
    %c0_0 = arith.constant 0 : index
    %0 = vector.load %arg1[%c0, %c0_0] : memref<8x128xf32, #tpu.memory_space<vmem>>, vector<8x128xf32>
    %c0_1 = arith.constant 0 : index
    %c0_2 = arith.constant 0 : index
    %1 = vector.load %arg0[%c0_1, %c0_2] : memref<8x128xf32, #tpu.memory_space<vmem>>, vector<8x128xf32>
    %2 = arith.subf %0, %1 : vector<8x128xf32>
    %3 = math.absf %2 : vector<8x128xf32>
    %4 = vector.shape_cast %3 : vector<8x128xf32> to vector<1x8x128xf32>
    %cst = arith.constant dense<0.000000e+00> : vector<1xf32>
    %5 = vector.multi_reduction <add>, %4, %cst [1, 2] : vector<1x8x128xf32> to vector<1xf32>
    %6 = vector.shape_cast %5 : vector<1xf32> to vector<1x1x1xf32>
    %7 = vector.extract %6[0, 0, 0] : f32 from vector<1x1x1xf32>
    %cst_3 = arith.constant 0.00416666688 : f32
    %8 = arith.mulf %7, %cst_3 : f32
    %cst_4 = arith.constant 9.99999974E-6 : f32
    %9 = arith.addf %8, %cst_4 : f32
    %c0_5 = arith.constant 0 : index
    %c0_6 = arith.constant 0 : index
    %10 = memref.load %arg2[%c0_5, %c0_6] : memref<1x1xf32, #tpu.memory_space<smem>>
    memref.store %9, %arg2[%c0_5, %c0_6] : memref<1x1xf32, #tpu.memory_space<smem>>
    return
  }
}

</mosaic_0001>

<bundles_post_ra>
// kernel: l1_loss.1
= control target key start
LH: loop header
LB: loop body
LE: loop exit
PB: predicated region body
PF: predicated region fallthrough
CT: control target
= control target key end

     0   :  { %s91_s0 = inlined_call_operand.vmem [shape: f32[8,128], index: 0, kind: input, shape index: {}]   ;;  %s92_s1 = inlined_call_operand.vmem [shape: f32[8,128], index: 1, kind: input, shape index: {}]   ;;  %s93_s2 = inlined_call_operand.hbm [shape: f32[1,1], index: 2, kind: output, shape index: {}]  }
   0x1   :  { %v12_v0 = vld [vmem:[%s92_s1] sm:$0xff] }
   0x2   :  { %v13_v1 = vld [vmem:[%s91_s0] sm:$0xff] }
   0x3   :  { %7 = vsyncpa [#allocation3], 0  ;;  %v14_v2 = vsub.f32 %v12_v0, %v13_v1  ;;  %s45_s0 = scalar_lea.hbm %s93_s2, 16 }
   0x4   :  { %p46_p0 = scmp.ne.s32.totalorder %s93_s2, %s45_s0  ;;  %p49_p1 = scmp.lt.u32.totalorder %s45_s0, %s93_s2 }
   0x5   :  { %v15_v3 = vand.u32 2147483647, %v14_v2 }
   0x6   :  { %p51_p2 = pnand %p49_p1, %p46_p0 }
   0x7   :  { %16 = vadd.xlane.f32.xlu0 %v15_v3 }
  0x94   :  { %v17_v4 = vpop.xlane.xlu0 %16 }
  0x95   :  { %v18_v5 = vrot.slane %v17_v4, 4 }
  0x97   :  { %v19_v6 = vadd.f32 %v18_v5, %v17_v4 }
  0x99   :  { %v20_v7 = vrot.slane %v19_v6, 2 }
  0x9b   :  { %v21_v8 = vadd.f32 %v20_v7, %v19_v6 }
  0x9d   :  { %v22_v9 = vrot.slane %v21_v8, 1 }
  0x9f   :  { %v23_v10 = vadd.f32 %v22_v9, %v21_v8 }
  0xa1   :  { %42 = vpush %v23_v10 }
  0xd2   :  { %s43_s13 = spop %42 }
  0xd3   :  { %s25_s14 = smul.f32 0.004166667, %s43_s13 }
  0xd5   :  { %s26_s15 = sadd.f32 1e-05, %s25_s14 }
  0xd7   :  { %28 = sst [smem:[#allocation2]] %s26_s15 }
  0xd8   :  { %54 = shalt.err (!%p51_p2)
}
  0xd9   :  { %s57_s21 = smov [#allocation2]  }
  0xda   :  { %36 = dma.smem_to_hbm %s57_s21, 16, %s93_s2, [#allocation3]  }
  0xdb   :  { %55 = dma.done.wait [#allocation3], 16  }
  0xdc   :  { %56 = vsyncadd [#allocation3], 4294967280 }
  0xdd   :  { %40 = sfence }
  0xde   :  { %41 = vsyncpa [#allocation3], 1 }

</bundles_post_ra>
